<compile_context>
chip_gen: v7x
topology: tpu7x:2x2x1
jax: 0.10.0
libtpu: 0.0.40
codegen_flags: <defaults>
</compile_context>

<pallas_src>
import functools

import jax
import jax.numpy as jnp
from jax.experimental import pallas as pl
from jax.experimental.pallas import tpu as pltpu

_LANES = 128
_SUBLANES = 8
_NEG_INF = -1e30
_MAX_TOK_TILE = 256


def _round_up(x, m):
    return ((x + m - 1) // m) * m


def _vmem_kwargs(vr, vp, tok_tile):
    # Resident table + double-buffered logits slab + id/target slabs + slack.
    needed = (vr * vp * 4) + (4 * tok_tile * vp * 4) + (4 * tok_tile * 4) + (1 << 20)
    if needed <= (24 << 20):
        return {}
    # TODO(synk): for very large vocabularies (table > ~48 MiB) the resident
    # table no longer fits VMEM (esp. v7x's 64 MiB); fall back to a
    # row-gather / class-tiled path instead of raising the limit further.
    return {"vmem_limit_bytes": int(min(needed + (8 << 20), 64 << 20))}


def _bigram_loss_kernel(ids_ref, tgt_ref, tab_ref, logits_ref, loss_ref, *,
                        n_tokens, tok_tile, tiles_per_split):
    # ids_ref, tgt_ref : (tok_tile, 1) int32   token / target ids
    # tab_ref          : (Vr, Vp)      f32     resident padded table
    # logits_ref       : (tok_tile, Vp) f32    streamed logits slab
    # loss_ref         : (1, 8, 128)   f32     per-split resident partial sum
    s = pl.program_id(0)
    i = pl.program_id(1)

    @pl.when(i == 0)
    def _init():
        loss_ref[...] = jnp.zeros_like(loss_ref)

    vr = tab_ref.shape[0]
    ids = ids_ref[...]                                            # (tok_tile, 1)
    lane = jax.lax.broadcasted_iota(jnp.int32, (tok_tile, vr), 1)
    onehot = (lane == ids).astype(tab_ref.dtype)                  # (tok_tile, Vr)

    # Row gather on the MXU: one_hot @ table -> (tok_tile, Vp).
    logits = jnp.dot(onehot, tab_ref[...], preferred_element_type=jnp.float32)
    logits_ref[...] = logits                                      # dense slab store

    # Numerically-stable logsumexp; padded class lanes already hold -1e30
    # from the table padding, so no extra mask is needed.
    m = jnp.max(logits, axis=-1, keepdims=True)                   # (tok_tile, 1)
    lse = jnp.log(jnp.sum(jnp.exp(logits - m), axis=-1, keepdims=True)) + m

    # Target logit via a single lane select (no second matmul).
    cls = jax.lax.broadcasted_iota(jnp.int32, logits.shape, 1)
    tgt_logit = jnp.sum(jnp.where(cls == tgt_ref[...], logits, 0.0),
                        axis=-1, keepdims=True)                   # (tok_tile, 1)

    # Mask tokens that only exist because of padding up to a full tile.
    tile_start = (s * tiles_per_split + i) * tok_tile
    tok_idx = tile_start + jax.lax.broadcasted_iota(jnp.int32, (tok_tile, 1), 0)
    contrib = jnp.where(tok_idx < n_tokens, lse - tgt_logit, 0.0)

    # One partial-sum accumulate per tile (not per token).
    loss_ref[...] = loss_ref[...] + jnp.sum(contrib)


def _bigram_logits_kernel(ids_ref, tab_ref, logits_ref):
    vr = tab_ref.shape[0]
    tok_tile = ids_ref.shape[0]
    ids = ids_ref[...]
    lane = jax.lax.broadcasted_iota(jnp.int32, (tok_tile, vr), 1)
    onehot = (lane == ids).astype(tab_ref.dtype)
    logits_ref[...] = jnp.dot(onehot, tab_ref[...],
                              preferred_element_type=jnp.float32)


@functools.partial(jax.jit, static_argnames=("vocab_size", "has_targets"))
def _forward_impl(xb, yb, table_p, vocab_size, has_targets):
    B, T = xb.shape
    V = vocab_size
    Vr, Vp = table_p.shape
    N = B * T

    tok_tile = min(_MAX_TOK_TILE, _round_up(max(N, 1), _SUBLANES))
    n_tiles = -(-N // tok_tile)

    # TODO(synk): PyTorch raises on out-of-range token ids; we clip instead to
    # keep the in-kernel gather in bounds.
    ids = jnp.clip(xb.reshape(N).astype(jnp.int32), 0, V - 1)

    if has_targets:
        num_splits = 2 if n_tiles >= 2 else 1      # v7x: split loss over 2 TCs
        tiles_per_split = -(-n_tiles // num_splits)
        n_pad = num_splits * tiles_per_split * tok_tile

        tgts = jnp.clip(yb.reshape(N).astype(jnp.int32), 0, V - 1)
        ids_p = jnp.pad(ids, (0, n_pad - N)).reshape(n_pad, 1)
        tgt_p = jnp.pad(tgts, (0, n_pad - N)).reshape(n_pad, 1)

        kernel = functools.partial(_bigram_loss_kernel, n_tokens=N,
                                   tok_tile=tok_tile,
                                   tiles_per_split=tiles_per_split)

        def tok_map(s, i):
            return (s * tiles_per_split + i, 0)

        grid_spec = pltpu.PrefetchScalarGridSpec(
            num_scalar_prefetch=0,
            grid=(num_splits, tiles_per_split),
            in_specs=[
                pl.BlockSpec((tok_tile, 1), tok_map),
                pl.BlockSpec((tok_tile, 1), tok_map),
                pl.BlockSpec((Vr, Vp), lambda s, i: (0, 0)),   # resident table
            ],
            out_specs=(
                pl.BlockSpec((tok_tile, Vp), tok_map),
                pl.BlockSpec((1, _SUBLANES, _LANES), lambda s, i: (s, 0, 0)),
            ),
        )
        logits_p, partial = pl.pallas_call(
            kernel,
            grid_spec=grid_spec,
            out_shape=(
                jax.ShapeDtypeStruct((n_pad, Vp), jnp.float32),
                jax.ShapeDtypeStruct((num_splits, _SUBLANES, _LANES),
                                     jnp.float32),
            ),
            compiler_params=pltpu.CompilerParams(
                dimension_semantics=("parallel", "arbitrary"),
                **_vmem_kwargs(Vr, Vp, tok_tile)),
        )(ids_p, tgt_p, table_p)

        loss = jnp.sum(partial[:, 0, 0]) / N       # mean over real tokens
        # PyTorch returns the flattened (B*T, C) logits when yb is given.
        if n_pad != N or Vp != V:
            logits_flat = logits_p[:N, :V]
        else:
            logits_flat = logits_p
        return logits_flat, loss
    else:
        n_pad = n_tiles * tok_tile
        ids_p = jnp.pad(ids, (0, n_pad - N)).reshape(n_pad, 1)

        grid_spec = pltpu.PrefetchScalarGridSpec(
            num_scalar_prefetch=0,
            grid=(n_tiles,),
            in_specs=[
                pl.BlockSpec((tok_tile, 1), lambda i: (i, 0)),
                pl.BlockSpec((Vr, Vp), lambda i: (0, 0)),      # resident table
            ],
            out_specs=pl.BlockSpec((tok_tile, Vp), lambda i: (i, 0)),
        )
        logits_p = pl.pallas_call(
            _bigram_logits_kernel,
            grid_spec=grid_spec,
            out_shape=jax.ShapeDtypeStruct((n_pad, Vp), jnp.float32),
            compiler_params=pltpu.CompilerParams(
                dimension_semantics=("parallel",),
                **_vmem_kwargs(Vr, Vp, tok_tile)),
        )(ids_p, table_p)

        if n_pad != N or Vp != V:
            logits_p = logits_p[:N, :V]
        return logits_p.reshape(B, T, V), None


class BigramLanguageModel:
    """JAX/Pallas port of the PyTorch BigramLanguageModel."""

    def __init__(self, vocab_size, key):
        self.vocab_size = vocab_size
        # nn.Embedding default init: N(0, 1).
        self.token_emb_table = jax.random.normal(
            key, (vocab_size, vocab_size), dtype=jnp.float32)
        # Pad the table once (outside the jitted forward): contraction rows to
        # a lane-dense multiple of 128 with zeros (never selected by the
        # one-hot), class lanes to a multiple of 128 with -1e30 so the
        # in-kernel logsumexp needs no extra mask.
        vr = _round_up(vocab_size, _LANES)
        vp = _round_up(vocab_size, _LANES)
        tp = jnp.full((vr, vp), _NEG_INF, jnp.float32)
        tp = tp.at[:vocab_size, :vocab_size].set(self.token_emb_table)
        tp = tp.at[vocab_size:, :].set(0.0)
        self.table_padded = tp

    def __call__(self, xb, yb=None):
        return _forward_impl(xb, yb, self.table_padded,
                             vocab_size=self.vocab_size,
                             has_targets=yb is not None)


def _reference_forward(xb, yb, table):
    logits = table[xb]                       # (B, T, V)
    B, T, V = logits.shape
    lf = logits.reshape(B * T, V)
    yf = yb.reshape(B * T)
    m = jnp.max(lf, axis=-1, keepdims=True)
    lse = (jnp.log(jnp.sum(jnp.exp(lf - m), axis=-1, keepdims=True)) + m)[:, 0]
    tgt = jnp.take_along_axis(lf, yf[:, None], axis=-1)[:, 0]
    return lf, jnp.mean(lse - tgt)


if __name__ == "__main__":
    vocab_size = 64
    B, T = 2, 8

    key = jax.random.PRNGKey(0)
    k_tab, k_x, k_y = jax.random.split(key, 3)

    model = BigramLanguageModel(vocab_size, k_tab)
    xb = jax.random.randint(k_x, (B, T), 0, vocab_size, dtype=jnp.int32)
    yb = jax.random.randint(k_y, (B, T), 0, vocab_size, dtype=jnp.int32)

    # Path with targets (logits + cross-entropy loss).
    logits, loss = model(xb, yb)
    jax.block_until_ready((logits, loss))

    # Path without targets (logits only, loss is None).
    logits_only, loss_none = model(xb)
    jax.block_until_ready(logits_only)
    assert loss_none is None
    assert logits_only.shape == (B, T, vocab_size)

    # Check against a pure-JAX reference.
    ref_logits, ref_loss = _reference_forward(xb, yb, model.token_emb_table)
    assert logits.shape == (B * T, vocab_size)
    assert jnp.allclose(logits, ref_logits, atol=1e-5, rtol=1e-5)
    assert jnp.allclose(loss, ref_loss, atol=1e-5, rtol=1e-5)
    assert jnp.allclose(logits_only, model.token_emb_table[xb],
                        atol=1e-5, rtol=1e-5)

    # TODO(synk): `generate` uses torch.multinomial sampling inside a Python
    # loop; sampling is left to host-side JAX (not a kernel hot path).
    print("KERNEL_OK")
</pallas_src>

<mosaic_0001>
module attributes {stable_mosaic.version = 11 : i64} {
  func.func @_bigram_loss_kernel(%arg0: i32, %arg1: i32, %arg2: memref<16x1xi32, #tpu.memory_space<vmem>>, %arg3: memref<16x1xi32, #tpu.memory_space<vmem>>, %arg4: memref<128x128xf32, #tpu.memory_space<vmem>>, %arg5: memref<16x128xf32, #tpu.memory_space<vmem>>, %arg6: memref<1x8x128xf32, #tpu.memory_space<vmem>>) attributes {dimension_semantics = [#tpu.dimension_semantics<parallel>, #tpu.dimension_semantics<arbitrary>], iteration_bounds = array<i64: 1, 1>, scalar_prefetch = 0 : i64, scratch_operands = 0 : i64, tpu.core_type = #tpu.core_type<tc>, window_params = [{transform_indices = @transform_0, window_bounds = array<i64: 16, 1>}, {transform_indices = @transform_1, window_bounds = array<i64: 16, 1>}, {pipeline_mode = #tpu.pipeline_mode<synchronous>, transform_indices = @transform_2, window_bounds = array<i64: 128, 128>}, {transform_indices = @transform_3, window_bounds = array<i64: 16, 128>}, {transform_indices = @transform_4, window_bounds = array<i64: 1, 8, 128>}]} {
    %c0_i32 = arith.constant 0 : i32
    %0 = arith.cmpi eq, %arg1, %c0_i32 : i32
    %1 = arith.extui %0 : i1 to i32
    %c0_i32_0 = arith.constant 0 : i32
    %2 = arith.cmpi ne, %1, %c0_i32_0 : i32
    scf.if %2 {
      %cst_21 = arith.constant 0.000000e+00 : f32
      %48 = vector.broadcast %cst_21 : f32 to vector<1x8x128xf32>
      %c0_22 = arith.constant 0 : index
      %c0_23 = arith.constant 0 : index
      %c0_24 = arith.constant 0 : index
      %49 = vector.load %arg6[%c0_22, %c0_23, %c0_24] : memref<1x8x128xf32, #tpu.memory_space<vmem>>, vector<1x8x128xf32>
      tpu.vector_store %arg6[%c0_22, %c0_23, %c0_24], %48 {strides = array<i32>} : memref<1x8x128xf32, #tpu.memory_space<vmem>>, vector<1x8x128xf32>,
    } else {
    }
    %c0 = arith.constant 0 : index
    %c0_1 = arith.constant 0 : index
    %3 = vector.load %arg2[%c0, %c0_1] : memref<16x1xi32, #tpu.memory_space<vmem>>, vector<16x1xi32>
    %4 = tpu.iota {dimensions = array<i32: 1>} : vector<16x128xi32>
    %5 = vector.broadcast %3 : vector<16x1xi32> to vector<16x128xi32>
    %6 = arith.cmpi eq, %4, %5 : vector<16x128xi32>
    %7 = arith.extui %6 : vector<16x128xi1> to vector<16x128xi32>
    %8 = arith.sitofp %7 : vector<16x128xi32> to vector<16x128xf32>
    %c0_2 = arith.constant 0 : index
    %c0_3 = arith.constant 0 : index
    %9 = vector.load %arg4[%c0_2, %c0_3] : memref<128x128xf32, #tpu.memory_space<vmem>>, vector<128x128xf32>
    %cst = arith.constant dense<0.000000e+00> : vector<16x128xf32>
    %10 = tpu.matmul %8, %9, %cst {dimension_numbers = #tpu.dot_dimension_numbers<[1], [0], [0], [1], [0, 0, 1, 1], [], []>} : vector<16x128xf32>, vector<128x128xf32>, vector<16x128xf32> -> vector<16x128xf32>
    %c0_4 = arith.constant 0 : index
    %c0_5 = arith.constant 0 : index
    %11 = vector.load %arg5[%c0_4, %c0_5] : memref<16x128xf32, #tpu.memory_space<vmem>>, vector<16x128xf32>
    tpu.vector_store %arg5[%c0_4, %c0_5], %10 {strides = array<i32>} : memref<16x128xf32, #tpu.memory_space<vmem>>, vector<16x128xf32>,
    %cst_6 = arith.constant dense<0xFF800000> : vector<16xf32>
    %12 = vector.multi_reduction <maximumf>, %10, %cst_6 [1] : vector<16x128xf32> to vector<16xf32>
    %13 = vector.shape_cast %12 : vector<16xf32> to vector<16x1xf32>
    %14 = vector.broadcast %13 : vector<16x1xf32> to vector<16x128xf32>
    %15 = arith.subf %10, %14 : vector<16x128xf32>
    %16 = math.exp %15 : vector<16x128xf32>
    %cst_7 = arith.constant dense<0.000000e+00> : vector<16xf32>
    %17 = vector.multi_reduction <add>, %16, %cst_7 [1] : vector<16x128xf32> to vector<16xf32>
    %18 = vector.shape_cast %17 : vector<16xf32> to vector<16x1xf32>
    %19 = math.log %18 : vector<16x1xf32>
    %20 = arith.addf %19, %13 : vector<16x1xf32>
    %21 = tpu.iota {dimensions = array<i32: 1>} : vector<16x128xi32>
    %c0_8 = arith.constant 0 : index
    %c0_9 = arith.constant 0 : index
    %22 = vector.load %arg3[%c0_8, %c0_9] : memref<16x1xi32, #tpu.memory_space<vmem>>, vector<16x1xi32>
    %23 = vector.broadcast %22 : vector<16x1xi32> to vector<16x128xi32>
    %24 = arith.cmpi eq, %21, %23 : vector<16x128xi32>
    %cst_10 = arith.constant 0.000000e+00 : f32
    %25 = vector.broadcast %cst_10 : f32 to vector<16x128xf32>
    %26 = arith.select %24, %10, %25 : vector<16x128xi1>, vector<16x128xf32>
    %cst_11 = arith.constant dense<0.000000e+00> : vector<16xf32>
    %27 = vector.multi_reduction <add>, %26, %cst_11 [1] : vector<16x128xf32> to vector<16xf32>
    %28 = vector.shape_cast %27 : vector<16xf32> to vector<16x1xf32>
    %c1_i32 = arith.constant 1 : i32
    %29 = arith.muli %arg0, %c1_i32 : i32
    %30 = arith.addi %29, %arg1 : i32
    %c16_i32 = arith.constant 16 : i32
    %31 = arith.muli %30, %c16_i32 : i32
    %32 = tpu.iota {dimensions = array<i32: 0>} : vector<16x1xi32>
    %33 = vector.broadcast %31 : i32 to vector<16x1xi32>
    %34 = arith.addi %33, %32 : vector<16x1xi32>
    %c16_i32_12 = arith.constant 16 : i32
    %35 = vector.broadcast %c16_i32_12 : i32 to vector<16x1xi32>
    %36 = arith.cmpi slt, %34, %35 : vector<16x1xi32>
    %37 = arith.subf %20, %28 : vector<16x1xf32>
    %cst_13 = arith.constant 0.000000e+00 : f32
    %38 = vector.broadcast %cst_13 : f32 to vector<16x1xf32>
    %39 = arith.select %36, %37, %38 : vector<16x1xi1>, vector<16x1xf32>
    %c0_14 = arith.constant 0 : index
    %c0_15 = arith.constant 0 : index
    %c0_16 = arith.constant 0 : index
    %40 = vector.load %arg6[%c0_14, %c0_15, %c0_16] : memref<1x8x128xf32, #tpu.memory_space<vmem>>, vector<1x8x128xf32>
    %41 = vector.shape_cast %39 : vector<16x1xf32> to vector<1x16x1xf32>
    %cst_17 = arith.constant dense<0.000000e+00> : vector<1xf32>
    %42 = vector.multi_reduction <add>, %41, %cst_17 [1, 2] : vector<1x16x1xf32> to vector<1xf32>
    %43 = vector.shape_cast %42 : vector<1xf32> to vector<1x1x1xf32>
    %44 = vector.extract %43[0, 0, 0] : f32 from vector<1x1x1xf32>
    %45 = vector.broadcast %44 : f32 to vector<1x8x128xf32>
    %46 = arith.addf %40, %45 : vector<1x8x128xf32>
    %c0_18 = arith.constant 0 : index
    %c0_19 = arith.constant 0 : index
    %c0_20 = arith.constant 0 : index
    %47 = vector.load %arg6[%c0_18, %c0_19, %c0_20] : memref<1x8x128xf32, #tpu.memory_space<vmem>>, vector<1x8x128xf32>
    tpu.vector_store %arg6[%c0_18, %c0_19, %c0_20], %46 {strides = array<i32>} : memref<1x8x128xf32, #tpu.memory_space<vmem>>, vector<1x8x128xf32>,
    return
  }
  func.func @transform_0(%arg0: i32, %arg1: i32) -> (i32, i32) {
    %c1_i32 = arith.constant 1 : i32
    %0 = arith.muli %arg0, %c1_i32 : i32
    %1 = arith.addi %0, %arg1 : i32
    %c0_i32 = arith.constant 0 : i32
    %c0_i32_0 = arith.constant 0 : i32
    return %1, %c0_i32 : i32, i32
  }
  func.func @transform_1(%arg0: i32, %arg1: i32) -> (i32, i32) {
    %c1_i32 = arith.constant 1 : i32
    %0 = arith.muli %arg0, %c1_i32 : i32
    %1 = arith.addi %0, %arg1 : i32
    %c0_i32 = arith.constant 0 : i32
    %c0_i32_0 = arith.constant 0 : i32
    return %1, %c0_i32 : i32, i32
  }
  func.func @transform_2(%arg0: i32, %arg1: i32) -> (i32, i32) {
    %c0_i32 = arith.constant 0 : i32
    %c0_i32_0 = arith.constant 0 : i32
    %c0_i32_1 = arith.constant 0 : i32
    return %c0_i32, %c0_i32_0 : i32, i32
  }
  func.func @transform_3(%arg0: i32, %arg1: i32) -> (i32, i32) {
    %c1_i32 = arith.constant 1 : i32
    %0 = arith.muli %arg0, %c1_i32 : i32
    %1 = arith.addi %0, %arg1 : i32
    %c0_i32 = arith.constant 0 : i32
    %c0_i32_0 = arith.constant 0 : i32
    return %1, %c0_i32 : i32, i32
  }
  func.func @transform_4(%arg0: i32, %arg1: i32) -> (i32, i32, i32) {
    %c0_i32 = arith.constant 0 : i32
    %c0_i32_0 = arith.constant 0 : i32
    %c0_i32_1 = arith.constant 0 : i32
    return %arg0, %c0_i32, %c0_i32_0 : i32, i32, i32
  }
}

</mosaic_0001>

<bundles_post_ra>
// kernel: _forward_impl.1
= control target key start
LH: loop header
LB: loop body
LE: loop exit
PB: predicated region body
PF: predicated region fallthrough
CT: control target
= control target key end

     0   :  { %10 = vsyncpa [#allocation3], 0  ;;  %s527_s0 = inlined_call_operand.vmem [shape: s32[16,1], index: 0, kind: input, shape index: {}]   ;;  %s528_s1 = inlined_call_operand.vmem [shape: s32[16,1], index: 1, kind: input, shape index: {}]   ;;  %s529_s2 = inlined_call_operand.hbm [shape: f32[128,128], index: 2, kind: input, shape index: {}]   ;;  %s530_s3 = inlined_call_operand.hbm [shape: f32[16,128], index: 3, kind: output, shape index: {0}]   ;;  %s531_s4 = inlined_call_operand.vmem [shape: f32[1,8,128], index: 4, kind: output, shape index: {1}]  }
   0x1   :  { %11 = vsyncpa [#allocation4], 0  ;;  %s451_s15 = smov [#allocation2]   ;;  %s403_s19 = scalar_lea.hbm %s529_s2, 2048 }
   0x2   :  { %s37_s16 = sshll.u32 %s451_s15, 4  ;;  %p404_p0 = scmp.ne.s32.totalorder %s529_s2, %s403_s19  ;;  %s38_s16 = int_to_ptr.vmem [resolvable:$true] %s37_s16 }
   0x3   :  { %p407_p1 = scmp.lt.u32.totalorder %s403_s19, %s529_s2 }
   0x5   :  { %p409_p2 = pnand %p407_p1, %p404_p0 }
   0x7   :  { %412 = shalt.err (!%p409_p2)
}
   0x8   :  { %s413_s24 = scalar_lea.vmem %s38_s16, 2048  ;;  %p418_p4 = scmp.lt.s32.totalorder %s38_s16, %s38_s16 }
   0x9   :  { %p414_p3 = scmp.ne.s32.totalorder %s38_s16, %s413_s24  ;;  %p419_p5 = scmp.lt.s32.totalorder %s413_s24, %s413_s24 }
   0xb   :  { %p420_p6 = por %p419_p5, %p418_p4 }
   0xd   :  { %p421_p7 = pnand %p420_p6, %p414_p3 }
   0xf   :  { %424 = shalt.err (!%p421_p7)
}
  0x10   :  { %s452_s25 = smov 128   ;;  %s453_s26 = smov 8  }
  0x11   :  { %43 = dma.hbm_to_vmem [thread:$0]  %s529_s2, 2048, %s38_s16, [#allocation3], %s452_s25, %s452_s25, %s453_s26  }
  0x12   :  { %447 = dma.done.wait [#allocation3], 2048  }
  0x13   :  { %448 = vsyncadd [#allocation3], 4294965248  ;;  %v454_v0 = vmov 0   ;;  %v82_v1 = vld [vmem:[%s527_s0] sm:$0xff]  ;;  %v99_v3 = vld [vmem:[#allocation2 + $0x8] sm:$0xff]  ;;  %v84_v28 = vlaneseq  ;;  %v455_v31 = vmov 1.0  }
  0x14   :  { %393 = vset.pattern.permute.xlu0 %v454_v0  ;;  %394 = vset.pattern.permute.xlu1 %v454_v0  ;;  %v98_v2 = vld [vmem:[#allocation2] sm:$0xff]  ;;  %v100_v4 = vld [vmem:[#allocation2 + $0x10] sm:$0xff]  ;;  %v83_v5 = vld [vmem:[%s527_s0 + $0x8] sm:$0xff]  ;;  %vm242_vm4 = vcmask 7168  }
  0x15   :  { %87 = vperm.xlu0 %393, %v82_v1   ;;  %v352_v6 = vpack.c.bf16 %v99_v3, %v98_v2  ;;  %v101_v7 = vld [vmem:[#allocation2 + $0x18] sm:$0xff]  ;;  %v102_v9 = vld [vmem:[#allocation2 + $0x20] sm:$0xff]  ;;  %v103_v10 = vld [vmem:[#allocation2 + $0x28] sm:$0xff]  ;;  %v85_v29 = vand.u32 127, %v84_v28 }
  0x16   :  { %v356_v8 = vpack.c.bf16 %v101_v7, %v100_v4  ;;  %v211_v11 = vld [vmem:[%s528_s1] sm:$0xff]  ;;  %v360_v12 = vpack.c.bf16 %v103_v10, %v102_v9  ;;  %v104_v13 = vld [vmem:[#allocation2 + $0x30] sm:$0xff]  ;;  %v105_v14 = vld [vmem:[#allocation2 + $0x38] sm:$0xff] }
  0x17   :  { %353 = vmatprep.subr.bf16.mxu0 %v352_v6  ;;  %v364_v15 = vpack.c.bf16 %v105_v14, %v104_v13  ;;  %v106_v16 = vld [vmem:[#allocation2 + $0x40] sm:$0xff]  ;;  %v107_v17 = vld [vmem:[#allocation2 + $0x48] sm:$0xff]  ;;  %v108_v19 = vld [vmem:[#allocation2 + $0x50] sm:$0xff] }
  0x18   :  { %355 = vmatpush3.bf16.msra.mxu0 %v352_v6  ;;  %v368_v18 = vpack.c.bf16 %v107_v17, %v106_v16  ;;  %v109_v20 = vld [vmem:[#allocation2 + $0x58] sm:$0xff]  ;;  %v110_v22 = vld [vmem:[#allocation2 + $0x60] sm:$0xff]  ;;  %v111_v23 = vld [vmem:[#allocation2 + $0x68] sm:$0xff] }
  0x19   :  { %90 = vperm.xlu0 %393, %v83_v5   ;;  %357 = vmatprep.subr.bf16.mxu0 %v356_v8  ;;  %v372_v21 = vpack.c.bf16 %v109_v20, %v108_v19  ;;  %v376_v24 = vpack.c.bf16 %v111_v23, %v110_v22  ;;  %v112_v25 = vld [vmem:[#allocation2 + $0x70] sm:$0xff]  ;;  %v113_v26 = vld [vmem:[#allocation2 + $0x78] sm:$0xff]  ;;  %v212_v35 = vld [vmem:[%s528_s1 + $0x8] sm:$0xff]  ;;  %s456_s1 = smov [#allocation5]  }
  0x1a   :  { %v380_v27 = vpack.c.bf16 %v113_v26, %v112_v25  ;;  %s267_s9 = sshll.u32 %s456_s1, 4  ;;  %s268_s9 = int_to_ptr.vmem [resolvable:$true] %s267_s9 }
  0x1b   :  { %s425_s10 = scalar_lea.vmem %s268_s9, 256  ;;  %p430_p9 = scmp.lt.s32.totalorder %s268_s9, %s268_s9 }
  0x1c   :  { %359 = vmatpush3.bf16.msra.mxu0 %v356_v8  ;;  %p426_p8 = scmp.ne.s32.totalorder %s268_s9, %s425_s10  ;;  %p431_p10 = scmp.lt.s32.totalorder %s425_s10, %s425_s10 }
  0x1d   :  { %214 = vperm.xlu0 %393, %v211_v11   ;;  %361 = vmatprep.subr.bf16.mxu0 %v360_v12 }
  0x1e   :  { %p432_p11 = por %p431_p10, %p430_p9 }
  0x20   :  { %363 = vmatpush3.bf16.msra.mxu0 %v360_v12  ;;  %p433_p12 = pnand %p432_p11, %p426_p8 }
  0x21   :  { %365 = vmatprep.subr.bf16.mxu0 %v364_v15 }
  0x24   :  { %367 = vmatpush3.bf16.msra.mxu0 %v364_v15 }
  0x25   :  { %369 = vmatprep.subr.bf16.mxu0 %v368_v18 }
  0x28   :  { %371 = vmatpush3.bf16.msra.mxu0 %v368_v18 }
  0x29   :  { %373 = vmatprep.subr.bf16.mxu0 %v372_v21 }
  0x2c   :  { %375 = vmatpush3.bf16.msra.mxu0 %v372_v21 }
  0x2d   :  { %377 = vmatprep.subr.bf16.mxu0 %v376_v24 }
  0x30   :  { %379 = vmatpush3.bf16.msra.mxu0 %v376_v24 }
  0x31   :  { %381 = vmatprep.subr.bf16.mxu0 %v380_v27 }
  0x34   :  { %383 = vmatpush3.bf16.msra.mxu0 %v380_v27 }
  0x94   :  { %v88_v30 = vpop.permute.xlu0 %87 }
  0x95   :  { %vm92_vm0 = vcmp.eq.s32.totalorder %v85_v29, %v88_v30 }
  0x96   :  { %349 = vmatprep.mubr.msk.f32.mxu0 %vm92_vm0, %v455_v31 }
  0x98   :  { %v91_v32 = vpop.permute.xlu0 %90 }
  0x99   :  { %vm93_vm1 = vcmp.eq.s32.totalorder %v85_v29, %v91_v32 }
  0x9a   :  { %350 = vmatmul.mubr.msk.f32.vlgmr.msra.gmra.mrb[0].mxu0 %vm93_vm1, %v455_v31 }
  0x9c   :  { %v215_v44 = vpop.permute.xlu0 %214 }
  0x9d   :  { %vm219_vm2 = vcmp.eq.s32.totalorder %v85_v29, %v215_v44 }
 0x16d   :  { %v351_v33 = vpop.f32.mrb[0].mxu0 }
 0x16e   :  { %190 = vst [vmem:[#allocation5 + $0x8] sm:$0xff] %v351_v33  ;;  %193 = vmax.xlane.f32.xlu1 %v351_v33  ;;  %v180_v34 = vpop.f32.mrb[1].mxu0 }
 0x16f   :  { %189 = vst [vmem:[#allocation5] sm:$0xff] %v180_v34  ;;  %v221_v46 = vsel %vm219_vm2, %v180_v34, 0.0 }
 0x172   :  { %191 = vmax.xlane.f32.xlu1 %v180_v34 }
 0x183   :  { %217 = vperm.xlu1 %394, %v212_v35  }
 0x1fb   :  { %v194_v36 = vpop.xlane.xlu1 %193 }
 0x1fc   :  { %v196_v37 = vsub.f32 %v351_v33, %v194_v36 }
 0x1fe   :  { %v199_v38 = vmul.f32 1.442695, %v196_v37 }
 0x1ff   :  { %v192_v39 = vpop.xlane.xlu1 %191 }
 0x200   :  { %395 = vpow2.f32 %v199_v38  ;;  %v195_v40 = vsub.f32 %v180_v34, %v192_v39 }
 0x202   :  { %v197_v41 = vmul.f32 1.442695, %v195_v40 }
 0x203   :  { %v218_v45 = vpop.permute.xlu1 %217 }
 0x204   :  { %397 = vpow2.f32 %v197_v41  ;;  %vm220_vm3 = vcmp.eq.s32.totalorder %v85_v29, %v218_v45 }
 0x205   :  { %v222_v47 = vsel %vm220_vm3, %v351_v33, 0.0 }
 0x20a   :  { %v396_v42 = vpop.eup %395 }
 0x20b   :  { %203 = vadd.xlane.f32.xlu1 %v396_v42 }
 0x20e   :  { %v398_v43 = vpop.eup %397 }
 0x20f   :  { %201 = vadd.xlane.f32.xlu0 %v398_v43 }
 0x213   :  { %223 = vadd.xlane.f32.xlu0 %v221_v46 }
 0x217   :  { %225 = vadd.xlane.f32.xlu0 %v222_v47 }
 0x298   :  { %v204_v48 = vpop.xlane.xlu1 %203 }
 0x299   :  { %399 = vlog2.f32 %v204_v48 }
 0x29c   :  { %v202_v49 = vpop.xlane.xlu0 %201 }
 0x29d   :  { %401 = vlog2.f32 %v202_v49 }
 0x2a0   :  { %v224_v51 = vpop.xlane.xlu0 %223 }
 0x2a3   :  { %v400_v50 = vpop.eup %399 }
 0x2a4   :  { %v208_v52 = vmul.f32 0.6931472, %v400_v50  ;;  %v226_v56 = vpop.xlane.xlu0 %225 }
 0x2a6   :  { %v210_v53 = vadd.f32 %v208_v52, %v194_v36 }
 0x2a7   :  { %v402_v54 = vpop.eup %401 }
 0x2a8   :  { %v206_v55 = vmul.f32 0.6931472, %v402_v54  ;;  %v238_v58 = vsub.f32 %v210_v53, %v226_v56 }
 0x2aa   :  { %v209_v57 = vadd.f32 %v206_v55, %v192_v39  ;;  %v244_v61 = vsel %vm242_vm4, %v238_v58, 0.0 }
 0x2ac   :  { %v237_v59 = vsub.f32 %v209_v57, %v224_v51 }
 0x2ae   :  { %v243_v60 = vsel %vm242_vm4, %v237_v59, 0.0 }
 0x2af   :  { %v245_v62 = vadd.f32 %v244_v61, %v243_v60 }
 0x2b1   :  { %246 = vadd.xlane.f32.xlu0 %v245_v62 }
 0x2b2   :  { %436 = shalt.err (!%p433_p12)
}
 0x2b3   :  { %s437_s13 = scalar_lea.hbm %s530_s3, 256 }
 0x2b4   :  { %p438_p13 = scmp.ne.s32.totalorder %s530_s3, %s437_s13  ;;  %p441_p0 = scmp.lt.u32.totalorder %s437_s13, %s530_s3 }
 0x2b6   :  { %p443_p1 = pnand %p441_p0, %p438_p13 }
 0x2b8   :  { %446 = shalt.err (!%p443_p1)
}
 0x2b9   :  { %273 = dma.vmem_to_hbm [thread:$0]  %s268_s9, 256, %s530_s3, [#allocation4], %s452_s25, %s452_s25, %s453_s26  }
 0x33e   :  { %v247_v63 = vpop.xlane.xlu0 %246 }
 0x33f   :  { %v248_v0 = vrot.slane %v247_v63, 4 }
 0x341   :  { %v249_v1 = vadd.f32 %v248_v0, %v247_v63 }
 0x343   :  { %v250_v2 = vrot.slane %v249_v1, 2 }
 0x345   :  { %v251_v3 = vadd.f32 %v250_v2, %v249_v1 }
 0x347   :  { %v252_v4 = vrot.slane %v251_v3, 1 }
 0x349   :  { %v253_v5 = vadd.f32 %v252_v4, %v251_v3 }
 0x34b   :  { %384 = vpush %v253_v5 }
 0x37c   :  { %s385_s20 = spop %384 }
 0x37d   :  { %v255_v6 = vstv %s385_s20 }
 0x37e   :  { %257 = vst [vmem:[%s531_s4] sm:$0xff] %v255_v6 }
 0x37f   :  { %449 = dma.done.wait [#allocation4], 256  }
 0x380   :  { %450 = vsyncadd [#allocation4], 4294967040 }
 0x381   :  { %281 = vsyncpa [#allocation3], 1 }
 0x382   :  { %282 = vsyncpa [#allocation4], 1 }

</bundles_post_ra>
